<compile_context>
chip_gen: v7x
topology: tpu7x:2x2x1
jax: 0.10.0
libtpu: 0.0.40
codegen_flags: <defaults>
</compile_context>

<pallas_src>
import functools

import jax
import jax.numpy as jnp
from jax.experimental import pallas as pl
from jax.experimental.pallas import tpu as pltpu

HALO = 128  # lane width of the cross-tile halo block (one vreg of lanes)


def _round_up(x, m):
    return ((x + m - 1) // m) * m


def _conv_geometry(W, K, S):
    Wout = (W - K) // S + 1
    Q = -(-K // S)          # taps after folding the stride into channels
    W2 = Wout + Q - 1       # super-columns per row (stride-1 domain)
    Wp = W2 * S             # input width consumed (pad or truncate to this)
    return Wout, Q, W2, Wp


def _space_to_depth(x_nchw, K, S):
    """(N,Cin,H,W) -> (Cin*S, N*H*W2); xs[ci*S+rs, (n*H+h)*W2+j] = x[n,ci,h,j*S+rs]."""
    N, Cin, H, W = x_nchw.shape
    _, _, W2, Wp = _conv_geometry(W, K, S)
    if Wp > W:
        xw = jnp.pad(x_nchw, ((0, 0), (0, 0), (0, 0), (0, Wp - W)))
    else:
        xw = x_nchw[:, :, :, :Wp]
    return (xw.reshape(N, Cin, H, W2, S)
              .transpose(1, 4, 0, 2, 3)
              .reshape(Cin * S, N * H * W2))


def _fold_params(params, K, S, eps):
    """Per-tap weights with the BN scale folded in, plus per-channel bias (f32)."""
    weight = params["conv_weight"].astype(jnp.float32)     # (Cout, Cin, 1, K)
    Cout, Cin = weight.shape[0], weight.shape[1]
    Q = -(-K // S)
    inv_std = jax.lax.rsqrt(params["bn_var"].astype(jnp.float32) + eps)
    scale = params["bn_weight"].astype(jnp.float32) * inv_std            # (Cout,)
    bias = ((params["conv_bias"].astype(jnp.float32)
             - params["bn_mean"].astype(jnp.float32)) * scale
            + params["bn_bias"].astype(jnp.float32)).reshape(Cout, 1)
    w3 = jnp.pad(weight[:, :, 0, :], ((0, 0), (0, 0), (0, Q * S - K)))   # zero taps >= K
    w_taps = (w3.reshape(Cout, Cin, Q, S).transpose(2, 0, 1, 3)
                .reshape(Q, Cout, Cin * S)) * scale[None, :, None]
    return w_taps, bias          # (Q, Cout, Cin*S) f32, (Cout, 1) f32


def _unflatten(y_cols, N, H, W2, Wout):
    Cout = y_cols.shape[0]
    return y_cols.reshape(Cout, N, H, W2)[:, :, :, :Wout].transpose(1, 0, 2, 3)


# ----------------------------- Pallas kernels --------------------------------

def _spatial_kernel_q1(x_ref, w_ref, bias_ref, o_ref):
    """K <= S: a single tap, no cross-tile halo needed."""
    acc = jnp.dot(w_ref[0], x_ref[...], preferred_element_type=jnp.float32)
    o_ref[...] = jnp.maximum(acc + bias_ref[...], 0.0).astype(o_ref.dtype)


def _spatial_kernel_halo(x_ref, halo_ref, w_ref, bias_ref, o_ref):
    """Fused conv-tap matmuls + folded-BN bias + ReLU for one lane-dense tile.

    x_ref    : (Cin*S, TJ)       current input tile (bf16)
    halo_ref : (Cin*S, 128)      first 128 columns after this tile (bf16)
    w_ref    : (Q, Cout, Cin*S)  per-tap weights, BN scale pre-folded (bf16)
    bias_ref : (Cout, 1)         folded conv-bias + BN shift (f32)
    o_ref    : (Cout, TJ)        output tile (out dtype)
    """
    x = x_ref[...]
    tj = x.shape[1]
    acc = jnp.dot(w_ref[0], x, preferred_element_type=jnp.float32)
    # Stitch the 128-lane halo onto the tile ONCE (aligned at a 128-lane
    # boundary).  Each tap then takes a static TJ-wide lane window of the
    # stitched array (one XLU lane-rotation per tap, no per-tap concatenates,
    # and no duplicate full-tile HBM fetch as in v2).
    xh = jnp.concatenate([x, halo_ref[...]], axis=1)        # (Cin*S, TJ + 128)
    # TODO(synk): for realistic channel counts (Cin*S, Cout >= 64) fold the Q
    # taps into one K = Q*Cin*S contraction (stack the shifted views along
    # sublanes, single jnp.dot) to fill the 256-wide MXU; at the tiny channel
    # counts exercised here the kernel is HBM-bound and per-tap dots are fine.
    for q in range(1, w_ref.shape[0]):                      # static unroll
        x_q = xh[:, q:q + tj]
        acc = acc + jnp.dot(w_ref[q], x_q, preferred_element_type=jnp.float32)
    o_ref[...] = jnp.maximum(acc + bias_ref[...], 0.0).astype(o_ref.dtype)


# ------------------------------- wrapper --------------------------------------

def _auto_tile_j(J, Cin2, Cout, Q, in_itemsize, out_itemsize,
                 budget_bytes=10 * 1024 * 1024):
    """Largest lane-dense tile that keeps the double-buffered footprint small."""
    def footprint(t):
        stream = 2 * Cin2 * (t + HALO) * in_itemsize + 2 * Cout * t * out_itemsize
        temps = 3 * Cin2 * t * in_itemsize + Cout * t * 4    # shifted views + f32 acc
        pinned = Q * Cout * Cin2 * in_itemsize + Cout * 4
        return stream + temps + pinned
    tj = 8192
    while tj > 256 and footprint(tj) > budget_bytes:
        tj //= 2
    while tj > 256 and J <= tj and J > 256:   # keep >= 2 grid steps (v7x megacore)
        tj //= 2
    return max(128, min(tj, _round_up(J, 128)))


def spatial_block_forward(x_nchw, params, kernel_size, stride, *, eps=1e-5,
                          tile_j=None, compute_dtype=jnp.bfloat16,
                          out_dtype=jnp.float32):
    """Fused Conv2d(kernel=(1,K), stride=(1,S)) + eval-mode BatchNorm2d + ReLU.

    x_nchw: (N, Cin, H, W) float32.  Returns (N, Cout, H, Wout) in out_dtype.
    """
    N, Cin, H, W = x_nchw.shape
    K, S = int(kernel_size), int(stride)
    Cout = params["conv_weight"].shape[0]
    Wout, Q, W2, _ = _conv_geometry(W, K, S)
    assert Wout >= 1, "conv output width must be positive"
    assert Q <= HALO, "taps after stride folding must fit inside the 128-lane halo"
    Cin2 = Cin * S
    J = N * H * W2

    # Conv bias + eval-mode BN folded into the weights (scale) and one bias.
    # TODO(synk): training-mode BatchNorm (batch statistics + running-stat
    # updates) is not implemented; this reproduces eval()-mode semantics.
    w_taps, bias = _fold_params(params, K, S, eps)
    w_taps = w_taps.astype(compute_dtype)

    # Single-pass stride-folding layout (no K-fold im2col duplication in HBM).
    # TODO(synk): this space-to-depth pass and the final NCHW transpose are each
    # a full HBM read+write; keeping the (Cin*S, N*H*W2) channels-last layout
    # resident across adjacent SpatialBlocks (or folding the stride in-kernel
    # from NCHW) would remove them for a memory-bound stack of these blocks.
    xs = _space_to_depth(x_nchw, K, S).astype(compute_dtype)

    if tile_j is None:
        tile_j = _auto_tile_j(J, Cin2, Cout, Q,
                              jnp.finfo(compute_dtype).bits // 8,
                              jnp.finfo(out_dtype).bits // 8)
    assert tile_j % 128 == 0, "tile_j must be a multiple of 128 (lane width)"

    n_tiles = -(-J // tile_j)
    Jp = n_tiles * tile_j

    x_spec = pl.BlockSpec((Cin2, tile_j), lambda i: (0, i))
    w_spec = pl.BlockSpec((Q, Cout, Cin2), lambda i: (0, 0, 0))
    b_spec = pl.BlockSpec((Cout, 1), lambda i: (0, 0))
    out_spec = pl.BlockSpec((Cout, tile_j), lambda i: (0, i))
    compiler_params = pltpu.CompilerParams(
        dimension_semantics=("parallel",),
        vmem_limit_bytes=32 * 1024 * 1024)
    out_shape = jax.ShapeDtypeStruct((Cout, Jp), out_dtype)

    if Q > 1:
        # Pad to a tile multiple plus one 128-lane halo so the halo block of the
        # last tile always exists (its content is zeros and is discarded).
        xs = jnp.pad(xs, ((0, 0), (0, Jp + HALO - J)))
        halo_blocks_per_tile = tile_j // HALO
        halo_spec = pl.BlockSpec(
            (Cin2, HALO), lambda i: (0, (i + 1) * halo_blocks_per_tile))
        out_padded = pl.pallas_call(
            _spatial_kernel_halo,
            out_shape=out_shape,
            grid=(n_tiles,),
            in_specs=[x_spec, halo_spec, w_spec, b_spec],
            out_specs=out_spec,
            compiler_params=compiler_params,
        )(xs, xs, w_taps, bias)
    else:
        xs = jnp.pad(xs, ((0, 0), (0, Jp - J)))
        out_padded = pl.pallas_call(
            _spatial_kernel_q1,
            out_shape=out_shape,
            grid=(n_tiles,),
            in_specs=[x_spec, w_spec, b_spec],
            out_specs=out_spec,
            compiler_params=compiler_params,
        )(xs, w_taps, bias)

    # (Cout, Jp) -> drop padded / garbage columns -> (N, Cout, H, Wout)
    return _unflatten(out_padded[:, :J], N, H, W2, Wout)


# ------------------------------ references ------------------------------------

def reference_forward(x_nchw, params, kernel_size, stride, eps=1e-5):
    """Plain-JAX reference (lax.conv + eval-mode BN + ReLU), full f32."""
    y = jax.lax.conv_general_dilated(
        x_nchw, params["conv_weight"],
        window_strides=(1, stride), padding="VALID",
        dimension_numbers=("NCHW", "OIHW", "NCHW"),
        precision=jax.lax.Precision.HIGHEST)
    y = y + params["conv_bias"].reshape(1, -1, 1, 1)
    inv_std = jax.lax.rsqrt(params["bn_var"] + eps)
    y = (y - params["bn_mean"].reshape(1, -1, 1, 1)) * \
        (params["bn_weight"] * inv_std).reshape(1, -1, 1, 1) + \
        params["bn_bias"].reshape(1, -1, 1, 1)
    return jnp.maximum(y, 0.0)


def emulated_forward(x_nchw, params, kernel_size, stride, *, eps=1e-5,
                     compute_dtype=jnp.bfloat16):
    """Plain-JAX emulation of the exact kernel math (same bf16 operands, f32 acc)."""
    N, Cin, H, W = x_nchw.shape
    K, S = int(kernel_size), int(stride)
    Wout, Q, W2, _ = _conv_geometry(W, K, S)
    w_taps, bias = _fold_params(params, K, S, eps)
    w = w_taps.astype(compute_dtype).astype(jnp.float32)
    xs = _space_to_depth(x_nchw, K, S).astype(compute_dtype).astype(jnp.float32)
    Cin2, J = xs.shape
    acc = jnp.dot(w[0], xs, precision=jax.lax.Precision.HIGHEST)
    for q in range(1, Q):
        xq = jnp.concatenate([xs[:, q:], jnp.zeros((Cin2, q), xs.dtype)], axis=1)
        acc = acc + jnp.dot(w[q], xq, precision=jax.lax.Precision.HIGHEST)
    return _unflatten(jnp.maximum(acc + bias, 0.0), N, H, W2, Wout)


def _make_params(key, Cin, Cout, K):
    k_w, k_b, k_g, k_beta, k_m, k_v = jax.random.split(key, 6)
    return {
        "conv_weight": jax.random.normal(k_w, (Cout, Cin, 1, K), jnp.float32) * 0.1,
        "conv_bias": jax.random.normal(k_b, (Cout,), jnp.float32) * 0.1,
        "bn_weight": 1.0 + 0.1 * jax.random.normal(k_g, (Cout,), jnp.float32),
        "bn_bias": 0.1 * jax.random.normal(k_beta, (Cout,), jnp.float32),
        "bn_mean": 0.1 * jax.random.normal(k_m, (Cout,), jnp.float32),
        "bn_var": jnp.abs(jax.random.normal(k_v, (Cout,), jnp.float32)) + 0.5,
    }


if __name__ == "__main__":
    configs = [
        # (N, Cin, Cout, H,  W,  K, S, tile_j, out_dtype)
        (2, 4,  8, 16, 16, 3, 2, 512,  jnp.float32),   # single tile; halo is zero pad
        (2, 4,  8, 16, 48, 3, 2, 256,  jnp.float32),   # multi-tile; boundary mid-row
        (2, 4,  8, 16, 20, 5, 3, 128,  jnp.float32),   # K % S != 0; tile_j == halo
        (2, 8, 16, 16, 64, 7, 1, None, jnp.float32),   # Q = 7 taps; auto tile_j
        (2, 4,  8, 16, 32, 2, 2, 256,  jnp.float32),   # Q = 1 (no-halo kernel)
        (2, 4,  8, 16, 48, 3, 2, 256,  jnp.bfloat16),  # bf16 output (half store bytes)
    ]
    for (N, Cin, Cout, H, W, K, S, tile_j, out_dtype) in configs:
        key = jax.random.PRNGKey(0)
        k_x, k_p = jax.random.split(key)
        x = jax.random.normal(k_x, (N, Cin, H, W), dtype=jnp.float32)
        params = _make_params(k_p, Cin, Cout, K)

        fwd = jax.jit(functools.partial(
            spatial_block_forward, kernel_size=K, stride=S,
            tile_j=tile_j, out_dtype=out_dtype))
        out = jax.block_until_ready(fwd(x, params)).astype(jnp.float32)

        Wout = (W - K) // S + 1
        assert out.shape == (N, Cout, H, Wout), (out.shape, (N, Cout, H, Wout))

        # Tight check: plain-JAX emulation of the exact kernel math (identical
        # bf16 operands, f32 accumulation) -> validates grid/halo/tap windows.
        ref_emu = jax.block_until_ready(emulated_forward(x, params, K, S))
        tol = 2e-2 if out_dtype == jnp.bfloat16 else 2e-3
        err_t = float(jnp.max(jnp.abs(out - ref_emu)))
        assert jnp.allclose(out, ref_emu, atol=tol, rtol=tol), (err_t, out_dtype)

        # Loose end-to-end check vs the full-f32 conv + BN + ReLU reference
        # (bounded bf16 quantization noise).
        ref_f32 = jax.block_until_ready(reference_forward(x, params, K, S))
        err_f = float(jnp.max(jnp.abs(out - ref_f32)))
        assert jnp.allclose(out, ref_f32, atol=5e-2, rtol=5e-2), (err_f, out_dtype)

    print("KERNEL_OK")
</pallas_src>

<mosaic_0001>
module attributes {stable_mosaic.version = 11 : i64} {
  func.func @_spatial_kernel_halo(%arg0: i32, %arg1: memref<8x512xbf16, #tpu.memory_space<vmem>>, %arg2: memref<8x128xbf16, #tpu.memory_space<vmem>>, %arg3: memref<2x8x8xbf16, #tpu.memory_space<vmem>>, %arg4: memref<8x1xf32, #tpu.memory_space<vmem>>, %arg5: memref<8x512xf32, #tpu.memory_space<vmem>>) attributes {dimension_semantics = [#tpu.dimension_semantics<parallel>], iteration_bounds = array<i64: 1>, scalar_prefetch = 0 : i64, scratch_operands = 0 : i64, tpu.core_type = #tpu.core_type<tc>, window_params = [{transform_indices = @transform_0, window_bounds = array<i64: 8, 512>}, {transform_indices = @transform_1, window_bounds = array<i64: 8, 128>}, {pipeline_mode = #tpu.pipeline_mode<synchronous>, transform_indices = @transform_2, window_bounds = array<i64: 2, 8, 8>}, {pipeline_mode = #tpu.pipeline_mode<synchronous>, transform_indices = @transform_3, window_bounds = array<i64: 8, 1>}, {transform_indices = @transform_4, window_bounds = array<i64: 8, 512>}]} {
    %c0 = arith.constant 0 : index
    %c0_0 = arith.constant 0 : index
    %0 = vector.load %arg1[%c0, %c0_0] : memref<8x512xbf16, #tpu.memory_space<vmem>>, vector<8x512xbf16>
    %c0_1 = arith.constant 0 : index
    %c0_2 = arith.constant 0 : index
    %c0_3 = arith.constant 0 : index
    %1 = vector.load %arg3[%c0_1, %c0_2, %c0_3] : memref<2x8x8xbf16, #tpu.memory_space<vmem>>, vector<1x8x8xbf16>
    %2 = vector.shape_cast %1 : vector<1x8x8xbf16> to vector<8x8xbf16>
    %cst = arith.constant dense<0.000000e+00> : vector<8x512xf32>
    %3 = tpu.matmul %2, %0, %cst {dimension_numbers = #tpu.dot_dimension_numbers<[1], [0], [0], [1], [0, 0, 1, 1], [], []>} : vector<8x8xbf16>, vector<8x512xbf16>, vector<8x512xf32> -> vector<8x512xf32>
    %c0_4 = arith.constant 0 : index
    %c0_5 = arith.constant 0 : index
    %4 = vector.load %arg2[%c0_4, %c0_5] : memref<8x128xbf16, #tpu.memory_space<vmem>>, vector<8x128xbf16>
    %5 = tpu.concatenate %0, %4 in 1 : vector<8x512xbf16>, vector<8x128xbf16> -> vector<8x640xbf16>
    %6 = vector.extract_strided_slice %5 {offsets = [0, 1], sizes = [8, 512], strides = [1, 1]} : vector<8x640xbf16> to vector<8x512xbf16>
    %c1 = arith.constant 1 : index
    %c0_6 = arith.constant 0 : index
    %c0_7 = arith.constant 0 : index
    %7 = vector.load %arg3[%c1, %c0_6, %c0_7] : memref<2x8x8xbf16, #tpu.memory_space<vmem>>, vector<1x8x8xbf16>
    %8 = vector.shape_cast %7 : vector<1x8x8xbf16> to vector<8x8xbf16>
    %cst_8 = arith.constant dense<0.000000e+00> : vector<8x512xf32>
    %9 = tpu.matmul %8, %6, %cst_8 {dimension_numbers = #tpu.dot_dimension_numbers<[1], [0], [0], [1], [0, 0, 1, 1], [], []>} : vector<8x8xbf16>, vector<8x512xbf16>, vector<8x512xf32> -> vector<8x512xf32>
    %10 = arith.addf %3, %9 : vector<8x512xf32>
    %c0_9 = arith.constant 0 : index
    %c0_10 = arith.constant 0 : index
    %11 = vector.load %arg4[%c0_9, %c0_10] : memref<8x1xf32, #tpu.memory_space<vmem>>, vector<8x1xf32>
    %12 = vector.broadcast %11 : vector<8x1xf32> to vector<8x512xf32>
    %13 = arith.addf %10, %12 : vector<8x512xf32>
    %cst_11 = arith.constant 0.000000e+00 : f32
    %14 = vector.broadcast %cst_11 : f32 to vector<8x512xf32>
    %15 = arith.maximumf %13, %14 : vector<8x512xf32>
    %c0_12 = arith.constant 0 : index
    %c0_13 = arith.constant 0 : index
    %16 = vector.load %arg5[%c0_12, %c0_13] : memref<8x512xf32, #tpu.memory_space<vmem>>, vector<8x512xf32>
    tpu.vector_store %arg5[%c0_12, %c0_13], %15 {strides = array<i32>} : memref<8x512xf32, #tpu.memory_space<vmem>>, vector<8x512xf32>,
    return
  }
  func.func @transform_0(%arg0: i32) -> (i32, i32) {
    %c0_i32 = arith.constant 0 : i32
    %c0_i32_0 = arith.constant 0 : i32
    return %c0_i32, %arg0 : i32, i32
  }
  func.func @transform_1(%arg0: i32) -> (i32, i32) {
    %c1_i32 = arith.constant 1 : i32
    %0 = arith.addi %arg0, %c1_i32 : i32
    %c4_i32 = arith.constant 4 : i32
    %1 = arith.muli %0, %c4_i32 : i32
    %c0_i32 = arith.constant 0 : i32
    %c0_i32_0 = arith.constant 0 : i32
    return %c0_i32, %1 : i32, i32
  }
  func.func @transform_2(%arg0: i32) -> (i32, i32, i32) {
    %c0_i32 = arith.constant 0 : i32
    %c0_i32_0 = arith.constant 0 : i32
    %c0_i32_1 = arith.constant 0 : i32
    %c0_i32_2 = arith.constant 0 : i32
    return %c0_i32, %c0_i32_0, %c0_i32_1 : i32, i32, i32
  }
  func.func @transform_3(%arg0: i32) -> (i32, i32) {
    %c0_i32 = arith.constant 0 : i32
    %c0_i32_0 = arith.constant 0 : i32
    %c0_i32_1 = arith.constant 0 : i32
    return %c0_i32, %c0_i32_0 : i32, i32
  }
  func.func @transform_4(%arg0: i32) -> (i32, i32) {
    %c0_i32 = arith.constant 0 : i32
    %c0_i32_0 = arith.constant 0 : i32
    return %c0_i32, %arg0 : i32, i32
  }
}

</mosaic_0001>

<bundles_post_ra>
// kernel: spatial_block_forward.1
= control target key start
LH: loop header
LB: loop body
LE: loop exit
PB: predicated region body
PF: predicated region fallthrough
CT: control target
= control target key end

     0   :  { %v318_v2 = vmov 0   ;;  %s319_s19 = smov 127   ;;  %vm67_vm0 = vcmask 1039360   ;;  %vm76_vm1 = vcmask 1043456   ;;  %vm72_vm2 = vcmask 64512   ;;  %s391_s0 = inlined_call_operand.vmem [shape: bf16[8,640], index: 0, kind: input, shape index: {}, may-alias: {0,1}]   ;;  %s392_s1 = inlined_call_operand.vmem [shape: bf16[8,640], index: 1, kind: input, shape index: {}, may-alias: {0,1}]   ;;  %s393_s3 = inlined_call_operand.vmem [shape: f32[8,1], index: 3, kind: input, shape index: {}]   ;;  %s394_s2 = inlined_call_operand.vmem [shape: bf16[2,8,8], index: 2, kind: input, shape index: {}]   ;;  %s395_s4 = inlined_call_operand.vmem [shape: f32[8,512], index: 4, kind: output, shape index: {}]  }
   0x1   :  { %v41_v0 = vld [vmem:[%s391_s0 + $0x8] sm:$0xff]  ;;  %v40_v1 = vld [vmem:[%s391_s0] sm:$0xff]  ;;  %121 = vmatprep.mubr.bf16.mxu0 %v318_v2  ;;  %162 = vmatprep.mubr.bf16.mxu1 %v318_v2  ;;  %v296_v7 = vld [vmem:[%s392_s1 + $0x10] sm:$0xf] }
   0x2   :  { %v299_v3 = vcombine.low %v41_v0, %v41_v0  ;;  %v297_v4 = vcombine.low %v40_v1, %v40_v1  ;;  %312 = vset.pattern.permute.xlu1 %v318_v2  ;;  %313 = vset.pattern.permute.xlu0 %v318_v2  ;;  %v300_v5 = vcombine.high %v41_v0, %v41_v0  ;;  %v268_v8 = vld [vmem:[%s393_s3] sm:$0xff] }
   0x3   :  { %v298_v6 = vcombine.high %v40_v1, %v40_v1  ;;  %v301_v16 = vld [vmem:[%s394_s2 + $0x4] sm:$0xf]  ;;  %v42_v23 = vld [vmem:[%s394_s2] sm:$0xf] }
   0x4   :  { %61 = vrot.lane.b32.xlu1 %v299_v3, %s319_s19  ;;  %57 = vrot.lane.b32.xlu0 %v297_v4, %s319_s19  ;;  %v175_v19 = vsel %vm76_vm1, %v297_v4, 0  ;;  %v181_v22 = vsel %vm76_vm1, %v299_v3, 0 }
   0x8   :  { %63 = vrot.lane.b32.xlu1 %v300_v5, %s319_s19  ;;  %59 = vrot.lane.b32.xlu0 %v298_v6, %s319_s19 }
   0xc   :  { %65 = vrot.lane.b32.xlu0 %v296_v7, %s319_s19  ;;  %271 = vperm.xlu1 %312, %v268_v8  }
  0x76   :  { %v62_v9 = vpop.permute.xlu1 %61  ;;  %v58_v10 = vpop.permute.xlu0 %57 }
  0x7a   :  { %v64_v11 = vpop.permute.xlu1 %63  ;;  %v60_v12 = vpop.permute.xlu0 %59 }
  0x7b   :  { %v69_v13 = vsel %vm67_vm0, %v60_v12, %v62_v9  ;;  %v68_v14 = vsel %vm67_vm0, %v58_v10, %v60_v12  ;;  %v70_v17 = vsel %vm67_vm0, %v62_v9, %v64_v11 }
  0x7c   :  { %302 = vmatprep.subr.msk.bf16.mxu0 %vm76_vm1, %v69_v13  ;;  %v78_v15 = vsel %vm76_vm1, %v68_v14, 0  ;;  %v84_v21 = vsel %vm76_vm1, %v70_v17, 0 }
  0x7d   :  { %90 = vmatpush1.bf16.msra.mxu0 %v78_v15 }
  0x7e   :  { %v66_v18 = vpop.permute.xlu0 %65  ;;  %306 = vmatprep.subr.msk.bf16.mxu0 %vm76_vm1, %v298_v6 }
  0x7f   :  { %v71_v20 = vsel %vm67_vm0, %v64_v11, %v66_v18 }
  0x80   :  { %303 = vmatmul.mubr.msk.bf16.vlgmr.msra.gmra.mrb[0].mxu0 %vm72_vm2, %v301_v16  ;;  %304 = vmatprep.subr.msk.bf16.mxu1 %vm76_vm1, %v71_v20 }
  0x81   :  { %131 = vmatpush1.bf16.msra.mxu1 %v84_v21  ;;  %187 = vmatpush1.bf16.msra.mxu0 %v175_v19 }
  0x82   :  { %308 = vmatprep.subr.msk.bf16.mxu1 %vm76_vm1, %v300_v5  ;;  %218 = vmatprep.mubr.bf16.mxu0 %v318_v2 }
  0x84   :  { %305 = vmatmul.mubr.msk.bf16.vlgmr.msra.gmra.mrb[0].mxu1 %vm72_vm2, %v301_v16 }
  0x85   :  { %228 = vmatpush1.bf16.msra.mxu1 %v181_v22  ;;  %259 = vmatprep.mubr.bf16.mxu1 %v318_v2 }
  0x88   :  { %307 = vmatmul.mubr.msk.bf16.vlgmr.msra.gmra.mrb[4].mxu0 %vm72_vm2, %v42_v23 }
  0x8b   :  { %v272_v33 = vpop.permute.xlu1 %271 }
  0x8c   :  { %309 = vmatmul.mubr.msk.bf16.vlgmr.msra.gmra.mrb[4].mxu1 %vm72_vm2, %v42_v23 }
 0x153   :  { %v123_v24 = vpop.f32.mrb[0].mxu0 }
 0x154   :  { %v125_v25 = vpop.f32.mrb[1].mxu0 }
 0x155   :  { %v127_v26 = vpop.f32.mrb[2].mxu0 }
 0x156   :  { %v128_v27 = vpop.f32.mrb[3].mxu0 }
 0x157   :  { %v164_v28 = vpop.f32.mrb[0].mxu1 }
 0x158   :  { %v166_v29 = vpop.f32.mrb[1].mxu1 }
 0x159   :  { %v168_v30 = vpop.f32.mrb[2].mxu1 }
 0x15a   :  { %v169_v31 = vpop.f32.mrb[3].mxu1 }
 0x15b   :  { %v220_v32 = vpop.f32.mrb[4].mxu0 }
 0x15c   :  { %v221_v34 = vadd.f32 %v220_v32, %v123_v24  ;;  %v222_v35 = vpop.f32.mrb[5].mxu0 }
 0x15d   :  { %v223_v36 = vadd.f32 %v222_v35, %v125_v25  ;;  %v224_v37 = vpop.f32.mrb[6].mxu0 }
 0x15e   :  { %v274_v38 = vadd.f32 %v272_v33, %v221_v34  ;;  %v225_v39 = vpop.f32.mrb[7].mxu0 }
 0x15f   :  { %v275_v40 = vadd.f32 %v272_v33, %v223_v36  ;;  %v261_v41 = vpop.f32.mrb[4].mxu1 }
 0x160   :  { %v278_v42 = vmax.f32 %v274_v38, 0.0  ;;  %v262_v43 = vadd.f32 %v261_v41, %v164_v28  ;;  %v263_v44 = vpop.f32.mrb[5].mxu1 }
 0x161   :  { %v279_v45 = vmax.f32 %v275_v40, 0.0  ;;  %v264_v46 = vadd.f32 %v263_v44, %v166_v29  ;;  %v265_v47 = vpop.f32.mrb[6].mxu1 }
 0x162   :  { %282 = vst [vmem:[%s395_s4] sm:$0xff] %v278_v42  ;;  %v276_v48 = vadd.f32 %v272_v33, %v262_v43  ;;  %v266_v49 = vpop.f32.mrb[7].mxu1 }
 0x163   :  { %283 = vst [vmem:[%s395_s4 + $0x8] sm:$0xff] %v279_v45  ;;  %v277_v50 = vadd.f32 %v272_v33, %v264_v46 }
 0x164   :  { %v280_v51 = vmax.f32 %v276_v48, 0.0 }
 0x165   :  { %v281_v52 = vmax.f32 %v277_v50, 0.0 }
 0x166   :  { %284 = vst [vmem:[%s395_s4 + $0x10] sm:$0xff] %v280_v51 }
 0x167   :  { %285 = vst [vmem:[%s395_s4 + $0x18] sm:$0xff] %v281_v52 }

</bundles_post_ra>
